<compile_context>
chip_gen: v5e
topology: v5e:2x2
jax: 0.10.0
libtpu: 0.0.40
codegen_flags: <defaults>
</compile_context>

<pallas_src>
import functools
import math

import jax
import jax.numpy as jnp
from jax.experimental import pallas as pl
from jax.experimental.pallas import tpu as pltpu

LANES = 128           # lane width / padded output-feature dim
WEIGHT_ROWS = 128     # padded contraction dim per bf16 weight block
BIAS_ROWS = 8         # each bias row padded to a full sublane group
X_COLS = 8            # x widened host-side from 3 -> 8 lane-slim columns
LOSS2_COL = 4         # output lane carrying the per-tile partial loss2
AUX_BIAS_OFF = 8      # aux slab: rows 0..7 = W_e1 (f32), then 6x8 bias rows


def linear_net_kernel(x_ref, w_ref, aux_ref, out_ref, *, n_rows, needs_mask):
    x8 = x_ref[...]                               # (TB, 8) f32, cols >= 3 zero
    tb = x8.shape[0]

    def wmat(i):                                  # (128, 128) bf16 weight block
        return w_ref[i * WEIGHT_ROWS:(i + 1) * WEIGHT_ROWS, :]

    def bias(i):                                  # (1, 128) f32 bias row
        r = AUX_BIAS_OFF + i * BIAS_ROWS
        return aux_ref[r:r + 1, :]

    def dense(h, i):
        # bf16 MXU operands, f32 accumulation; activations stay f32.
        return jnp.dot(h.astype(jnp.bfloat16), wmat(i),
                       preferred_element_type=jnp.float32) + bias(i + 1)

    # encoder1_1 (3->20): tiny-K f32 dot straight from the lane-slim input.
    w1 = aux_ref[0:8, :]                                          # (8,128) f32
    a1 = jnp.tanh(jnp.dot(x8, w1, preferred_element_type=jnp.float32) + bias(0))
    a2 = jnp.tanh(dense(a1, 0))            # encoder1_2 + tanh
    g1 = jnp.maximum(dense(a2, 1), 0.0)    # fused(encoder1_3, linear_x_1) + relu
    g2 = jnp.maximum(dense(g1, 2), 0.0)    # linear_x_2 + relu
    l2 = dense(g2, 3)                      # linear_x_3 (lanes >= 3 exactly 0)

    # Per-tile partial of ||l2 - x||_F^2 on the 8 lane-slim columns only
    # (remaining lanes of l2 and x are exactly zero by construction).
    diff = l2[:, 0:X_COLS] - x8
    sq = diff * diff
    if needs_mask:
        rows_g = (jax.lax.broadcasted_iota(jnp.int32, sq.shape, 0)
                  + pl.program_id(0) * tb)
        sq = jnp.where(rows_g < n_rows, sq, 0.0)
    partial_loss2 = jnp.sum(sq)

    # Tiny (8,128) output block: partial loss2 at (row 0, LOSS2_COL).
    rows = jax.lax.broadcasted_iota(jnp.int32, (BIAS_ROWS, LANES), 0)
    cols = jax.lax.broadcasted_iota(jnp.int32, (BIAS_ROWS, LANES), 1)
    base_blk = jnp.where((rows == 0) & (cols == LOSS2_COL), partial_loss2, 0.0)
    out_ref[...] = base_blk

    # Only grid step 0 contains the batch row the host reads enc[0,:] from:
    # recompute the real encoder1_3 output for the first 8 rows there.
    @pl.when(pl.program_id(0) == 0)
    def _():
        enc8 = (jnp.dot(a2[0:BIAS_ROWS, :].astype(jnp.bfloat16), wmat(4),
                        preferred_element_type=jnp.float32) + bias(5))
        out_ref[...] = jnp.where((rows == 0) & (cols != LOSS2_COL),
                                 enc8, base_blk)


def pack_params(layers):
    """Pack the 6 (w (in,out), b (out,)) pairs into two resident slabs.

    Returns:
      w_slab:  (5*128, 128) bf16  -- [W_e2, W_e3@W_x1 (fused), W_x2, W_x3, W_e3]
      aux:     (56, 128)    f32   -- rows 0..7: W_e1; then 6 bias blocks of 8
                                     rows each (bias in row 0): b_e1, b_e2,
                                     b_fused, b_x2, b_x3, b_e3.
    All padding is exactly zero (the kernel/host rely on that invariant).
    """
    (w_e1, b_e1), (w_e2, b_e2), (w_e3, b_e3), \
        (w_x1, b_x1), (w_x2, b_x2), (w_x3, b_x3) = layers

    def pad_w(w):
        out = jnp.zeros((WEIGHT_ROWS, LANES), jnp.float32)
        return out.at[:w.shape[0], :w.shape[1]].set(w.astype(jnp.float32))

    def pad_b(b):
        out = jnp.zeros((1, LANES), jnp.float32)
        return out.at[0, :b.shape[0]].set(b.astype(jnp.float32))

    # Fuse encoder1_3 with linear_x_1 (no nonlinearity between them):
    #   g_pre = (a2 @ We3 + be3) @ Wx1 + bx1 = a2 @ (We3@Wx1) + (be3@Wx1 + bx1)
    w_e3p, w_x1p = pad_w(w_e3), pad_w(w_x1)
    b_e3p, b_x1p = pad_b(b_e3), pad_b(b_x1)
    w_fused = jnp.dot(w_e3p, w_x1p)               # (128,128), padding stays 0
    b_fused = jnp.dot(b_e3p, w_x1p) + b_x1p       # (1,128)

    w_slab = jnp.concatenate(
        [pad_w(w_e2), w_fused, pad_w(w_x2), pad_w(w_x3), w_e3p],
        axis=0).astype(jnp.bfloat16)              # (640, 128) bf16

    def bias_block(bp):                           # (8,128), bias in row 0
        return jnp.concatenate(
            [bp, jnp.zeros((BIAS_ROWS - 1, LANES), jnp.float32)], axis=0)

    w_e1_blk = jnp.zeros((BIAS_ROWS, LANES), jnp.float32)
    w_e1_blk = w_e1_blk.at[:w_e1.shape[0], :w_e1.shape[1]].set(
        w_e1.astype(jnp.float32))
    aux = jnp.concatenate(
        [w_e1_blk,
         bias_block(pad_b(b_e1)), bias_block(pad_b(b_e2)), bias_block(b_fused),
         bias_block(pad_b(b_x2)), bias_block(pad_b(b_x3)), bias_block(b_e3p)],
        axis=0)                                   # (56, 128) f32
    return w_slab, aux


def _round_up(v, m):
    return ((v + m - 1) // m) * m


def linear_net_forward(x, u0, w_slab, aux_slab):
    # u0 mirrors the PyTorch signature but never affects the outputs.
    del u0
    n, f = x.shape

    # Batch tiling: 8-row aligned; split into >=2 tiles when possible so both
    # v7x TensorCores get work; cap at 2048 rows (f32 intermediates ~6 MiB).
    n8 = _round_up(n, 8)
    if n8 >= 16:
        tb = min(2048, _round_up((n8 + 1) // 2, 8))
    else:
        tb = n8
    n_pad = _round_up(n, tb)
    num_tiles = n_pad // tb

    # Lane-slim padded input slab: 3 real features + 5 zero lanes, zero rows
    # beyond n (their loss contribution is masked in-kernel).
    x8 = jnp.zeros((n_pad, X_COLS), jnp.float32)
    x8 = x8.at[:n, :f].set(x.astype(jnp.float32))

    kernel = functools.partial(linear_net_kernel,
                               n_rows=n, needs_mask=(n_pad != n))

    out = pl.pallas_call(
        kernel,
        out_shape=jax.ShapeDtypeStruct((num_tiles * BIAS_ROWS, LANES),
                                       jnp.float32),
        grid=(num_tiles,),
        in_specs=[
            pl.BlockSpec((tb, X_COLS), lambda i: (i, 0)),     # x tiles
            pl.BlockSpec(w_slab.shape, lambda i: (0, 0)),     # bf16 weights (resident)
            pl.BlockSpec(aux_slab.shape, lambda i: (0, 0)),   # f32 W_e1 + biases (resident)
        ],
        out_specs=pl.BlockSpec((BIAS_ROWS, LANES), lambda i: (i, 0)),
        compiler_params=pltpu.CompilerParams(
            dimension_semantics=("parallel",)),
    )(x8, w_slab, aux_slab)

    # Host-side (trivial XLA) scalar plumbing on the tiny output slab.
    loss2_sum = jnp.sum(out[:, LOSS2_COL])
    ge_z1 = out[0, 0]
    ge_z2 = out[0, 1]
    ge_x = out[0, 2]
    loss_re = (jnp.abs(ge_z1 * ge_z1 + ge_z2 * ge_z2 - 1.0)
               + jnp.abs(ge_x * ge_x) * 100.0)
    loss = loss2_sum + loss_re
    return (loss, ge_z1, ge_x, ge_z2, loss2_sum / 50.0)


def init_linear(key, fan_in, fan_out):
    """PyTorch nn.Linear default init: U(-1/sqrt(fan_in), 1/sqrt(fan_in)).

    Weight returned pre-transposed to (fan_in, fan_out); bias as (fan_out,).
    """
    kw, kb = jax.random.split(key)
    bound = 1.0 / math.sqrt(fan_in)
    w = jax.random.uniform(kw, (fan_in, fan_out), jnp.float32, -bound, bound)
    b = jax.random.uniform(kb, (fan_out,), jnp.float32, -bound, bound)
    return w, b


if __name__ == "__main__":
    key = jax.random.PRNGKey(0)
    keys = jax.random.split(key, 8)

    # Parameter shapes follow the module's __init__ (module order).
    layers = [
        init_linear(keys[0], 3, 20),    # encoder1_1
        init_linear(keys[1], 20, 20),   # encoder1_2
        init_linear(keys[2], 20, 3),    # encoder1_3
        init_linear(keys[3], 3, 20),    # linear_x_1
        init_linear(keys[4], 20, 20),   # linear_x_2
        init_linear(keys[5], 20, 3),    # linear_x_3
    ]
    w_slab, aux_slab = pack_params(layers)

    # Small deterministic inputs: batch of 8 points with 3 features.
    x = jax.random.normal(keys[6], (8, 3), jnp.float32)
    u0 = jax.random.normal(keys[7], (8, 3), jnp.float32)  # unused by forward

    out = linear_net_forward(x, u0, w_slab, aux_slab)
    jax.block_until_ready(out)
    print("KERNEL_OK")
</pallas_src>

<mosaic_0001>
module attributes {stable_mosaic.version = 11 : i64} {
  func.func @linear_net_kernel(%arg0: i32, %arg1: memref<8x8xf32, #tpu.memory_space<vmem>>, %arg2: memref<640x128xbf16, #tpu.memory_space<vmem>>, %arg3: memref<56x128xf32, #tpu.memory_space<vmem>>, %arg4: memref<8x128xf32, #tpu.memory_space<vmem>>) attributes {dimension_semantics = [#tpu.dimension_semantics<parallel>], iteration_bounds = array<i64: 1>, scalar_prefetch = 0 : i64, scratch_operands = 0 : i64, tpu.core_type = #tpu.core_type<tc>, window_params = [{transform_indices = @transform_0, window_bounds = array<i64: 8, 8>}, {pipeline_mode = #tpu.pipeline_mode<synchronous>, transform_indices = @transform_1, window_bounds = array<i64: 640, 128>}, {pipeline_mode = #tpu.pipeline_mode<synchronous>, transform_indices = @transform_2, window_bounds = array<i64: 56, 128>}, {transform_indices = @transform_3, window_bounds = array<i64: 8, 128>}]} {
    %c0 = arith.constant 0 : index
    %c0_0 = arith.constant 0 : index
    %0 = vector.load %arg1[%c0, %c0_0] : memref<8x8xf32, #tpu.memory_space<vmem>>, vector<8x8xf32>
    %c0_1 = arith.constant 0 : index
    %c0_2 = arith.constant 0 : index
    %1 = vector.load %arg3[%c0_1, %c0_2] : memref<56x128xf32, #tpu.memory_space<vmem>>, vector<8x128xf32>
    %cst = arith.constant dense<0.000000e+00> : vector<8x128xf32>
    %2 = tpu.matmul %0, %1, %cst {dimension_numbers = #tpu.dot_dimension_numbers<[1], [0], [0], [1], [0, 0, 1, 1], [], []>} : vector<8x8xf32>, vector<8x128xf32>, vector<8x128xf32> -> vector<8x128xf32>
    %c8 = arith.constant 8 : index
    %c0_3 = arith.constant 0 : index
    %3 = vector.load %arg3[%c8, %c0_3] : memref<56x128xf32, #tpu.memory_space<vmem>>, vector<1x128xf32>
    %4 = vector.broadcast %3 : vector<1x128xf32> to vector<8x128xf32>
    %5 = arith.addf %2, %4 : vector<8x128xf32>
    %6 = math.tanh %5 : vector<8x128xf32>
    %7 = arith.truncf %6 : vector<8x128xf32> to vector<8x128xbf16>
    %c0_4 = arith.constant 0 : index
    %c0_5 = arith.constant 0 : index
    %8 = vector.load %arg2[%c0_4, %c0_5] : memref<640x128xbf16, #tpu.memory_space<vmem>>, vector<128x128xbf16>
    %cst_6 = arith.constant dense<0.000000e+00> : vector<8x128xf32>
    %9 = tpu.matmul %7, %8, %cst_6 {dimension_numbers = #tpu.dot_dimension_numbers<[1], [0], [0], [1], [0, 0, 1, 1], [], []>} : vector<8x128xbf16>, vector<128x128xbf16>, vector<8x128xf32> -> vector<8x128xf32>
    %c16 = arith.constant 16 : index
    %c0_7 = arith.constant 0 : index
    %10 = vector.load %arg3[%c16, %c0_7] : memref<56x128xf32, #tpu.memory_space<vmem>>, vector<1x128xf32>
    %11 = vector.broadcast %10 : vector<1x128xf32> to vector<8x128xf32>
    %12 = arith.addf %9, %11 : vector<8x128xf32>
    %13 = math.tanh %12 : vector<8x128xf32>
    %14 = arith.truncf %13 : vector<8x128xf32> to vector<8x128xbf16>
    %c128 = arith.constant 128 : index
    %c0_8 = arith.constant 0 : index
    %15 = vector.load %arg2[%c128, %c0_8] : memref<640x128xbf16, #tpu.memory_space<vmem>>, vector<128x128xbf16>
    %cst_9 = arith.constant dense<0.000000e+00> : vector<8x128xf32>
    %16 = tpu.matmul %14, %15, %cst_9 {dimension_numbers = #tpu.dot_dimension_numbers<[1], [0], [0], [1], [0, 0, 1, 1], [], []>} : vector<8x128xbf16>, vector<128x128xbf16>, vector<8x128xf32> -> vector<8x128xf32>
    %c24 = arith.constant 24 : index
    %c0_10 = arith.constant 0 : index
    %17 = vector.load %arg3[%c24, %c0_10] : memref<56x128xf32, #tpu.memory_space<vmem>>, vector<1x128xf32>
    %18 = vector.broadcast %17 : vector<1x128xf32> to vector<8x128xf32>
    %19 = arith.addf %16, %18 : vector<8x128xf32>
    %cst_11 = arith.constant 0.000000e+00 : f32
    %20 = vector.broadcast %cst_11 : f32 to vector<8x128xf32>
    %21 = arith.maximumf %19, %20 : vector<8x128xf32>
    %22 = arith.truncf %21 : vector<8x128xf32> to vector<8x128xbf16>
    %c256 = arith.constant 256 : index
    %c0_12 = arith.constant 0 : index
    %23 = vector.load %arg2[%c256, %c0_12] : memref<640x128xbf16, #tpu.memory_space<vmem>>, vector<128x128xbf16>
    %cst_13 = arith.constant dense<0.000000e+00> : vector<8x128xf32>
    %24 = tpu.matmul %22, %23, %cst_13 {dimension_numbers = #tpu.dot_dimension_numbers<[1], [0], [0], [1], [0, 0, 1, 1], [], []>} : vector<8x128xbf16>, vector<128x128xbf16>, vector<8x128xf32> -> vector<8x128xf32>
    %c32 = arith.constant 32 : index
    %c0_14 = arith.constant 0 : index
    %25 = vector.load %arg3[%c32, %c0_14] : memref<56x128xf32, #tpu.memory_space<vmem>>, vector<1x128xf32>
    %26 = vector.broadcast %25 : vector<1x128xf32> to vector<8x128xf32>
    %27 = arith.addf %24, %26 : vector<8x128xf32>
    %cst_15 = arith.constant 0.000000e+00 : f32
    %28 = vector.broadcast %cst_15 : f32 to vector<8x128xf32>
    %29 = arith.maximumf %27, %28 : vector<8x128xf32>
    %30 = arith.truncf %29 : vector<8x128xf32> to vector<8x128xbf16>
    %c384 = arith.constant 384 : index
    %c0_16 = arith.constant 0 : index
    %31 = vector.load %arg2[%c384, %c0_16] : memref<640x128xbf16, #tpu.memory_space<vmem>>, vector<128x128xbf16>
    %cst_17 = arith.constant dense<0.000000e+00> : vector<8x128xf32>
    %32 = tpu.matmul %30, %31, %cst_17 {dimension_numbers = #tpu.dot_dimension_numbers<[1], [0], [0], [1], [0, 0, 1, 1], [], []>} : vector<8x128xbf16>, vector<128x128xbf16>, vector<8x128xf32> -> vector<8x128xf32>
    %c40 = arith.constant 40 : index
    %c0_18 = arith.constant 0 : index
    %33 = vector.load %arg3[%c40, %c0_18] : memref<56x128xf32, #tpu.memory_space<vmem>>, vector<1x128xf32>
    %34 = vector.broadcast %33 : vector<1x128xf32> to vector<8x128xf32>
    %35 = arith.addf %32, %34 : vector<8x128xf32>
    %36 = vector.extract_strided_slice %35 {offsets = [0, 0], sizes = [8, 8], strides = [1, 1]} : vector<8x128xf32> to vector<8x8xf32>
    %37 = arith.subf %36, %0 : vector<8x8xf32>
    %38 = arith.mulf %37, %37 : vector<8x8xf32>
    %39 = vector.shape_cast %38 : vector<8x8xf32> to vector<1x8x8xf32>
    %cst_19 = arith.constant dense<0.000000e+00> : vector<1xf32>
    %40 = vector.multi_reduction <add>, %39, %cst_19 [1, 2] : vector<1x8x8xf32> to vector<1xf32>
    %41 = vector.shape_cast %40 : vector<1xf32> to vector<1x1x1xf32>
    %42 = vector.extract %41[0, 0, 0] : f32 from vector<1x1x1xf32>
    %43 = tpu.iota {dimensions = array<i32: 0>} : vector<8x128xi32>
    %44 = tpu.iota {dimensions = array<i32: 1>} : vector<8x128xi32>
    %c0_i32 = arith.constant 0 : i32
    %45 = vector.broadcast %c0_i32 : i32 to vector<8x128xi32>
    %46 = arith.cmpi eq, %43, %45 : vector<8x128xi32>
    %c4_i32 = arith.constant 4 : i32
    %47 = vector.broadcast %c4_i32 : i32 to vector<8x128xi32>
    %48 = arith.cmpi eq, %44, %47 : vector<8x128xi32>
    %49 = arith.andi %46, %48 : vector<8x128xi1>
    %cst_20 = arith.constant 0.000000e+00 : f32
    %50 = vector.broadcast %42 : f32 to vector<8x128xf32>
    %51 = vector.broadcast %cst_20 : f32 to vector<8x128xf32>
    %52 = arith.select %49, %50, %51 : vector<8x128xi1>, vector<8x128xf32>
    %c0_21 = arith.constant 0 : index
    %c0_22 = arith.constant 0 : index
    %53 = vector.load %arg4[%c0_21, %c0_22] : memref<8x128xf32, #tpu.memory_space<vmem>>, vector<8x128xf32>
    tpu.vector_store %arg4[%c0_21, %c0_22], %52 {strides = array<i32>} : memref<8x128xf32, #tpu.memory_space<vmem>>, vector<8x128xf32>,
    %c0_i32_23 = arith.constant 0 : i32
    %54 = arith.cmpi eq, %arg0, %c0_i32_23 : i32
    %55 = arith.extui %54 : i1 to i32
    %c0_i32_24 = arith.constant 0 : i32
    %56 = arith.cmpi ne, %55, %c0_i32_24 : i32
    scf.if %56 {
      %57 = arith.truncf %13 : vector<8x128xf32> to vector<8x128xbf16>
      %c512 = arith.constant 512 : index
      %c0_25 = arith.constant 0 : index
      %58 = vector.load %arg2[%c512, %c0_25] : memref<640x128xbf16, #tpu.memory_space<vmem>>, vector<128x128xbf16>
      %cst_26 = arith.constant dense<0.000000e+00> : vector<8x128xf32>
      %59 = tpu.matmul %57, %58, %cst_26 {dimension_numbers = #tpu.dot_dimension_numbers<[1], [0], [0], [1], [0, 0, 1, 1], [], []>} : vector<8x128xbf16>, vector<128x128xbf16>, vector<8x128xf32> -> vector<8x128xf32>
      %c48 = arith.constant 48 : index
      %c0_27 = arith.constant 0 : index
      %60 = vector.load %arg3[%c48, %c0_27] : memref<56x128xf32, #tpu.memory_space<vmem>>, vector<1x128xf32>
      %61 = vector.broadcast %60 : vector<1x128xf32> to vector<8x128xf32>
      %62 = arith.addf %59, %61 : vector<8x128xf32>
      %c0_i32_28 = arith.constant 0 : i32
      %63 = vector.broadcast %c0_i32_28 : i32 to vector<8x128xi32>
      %64 = arith.cmpi eq, %43, %63 : vector<8x128xi32>
      %c4_i32_29 = arith.constant 4 : i32
      %65 = vector.broadcast %c4_i32_29 : i32 to vector<8x128xi32>
      %66 = arith.cmpi ne, %44, %65 : vector<8x128xi32>
      %67 = arith.andi %64, %66 : vector<8x128xi1>
      %68 = arith.select %67, %62, %52 : vector<8x128xi1>, vector<8x128xf32>
      %c0_30 = arith.constant 0 : index
      %c0_31 = arith.constant 0 : index
      %69 = vector.load %arg4[%c0_30, %c0_31] : memref<8x128xf32, #tpu.memory_space<vmem>>, vector<8x128xf32>
      tpu.vector_store %arg4[%c0_30, %c0_31], %68 {strides = array<i32>} : memref<8x128xf32, #tpu.memory_space<vmem>>, vector<8x128xf32>,
    } else {
    }
    return
  }
  func.func @transform_0(%arg0: i32) -> (i32, i32) {
    %c0_i32 = arith.constant 0 : i32
    %c0_i32_0 = arith.constant 0 : i32
    return %arg0, %c0_i32 : i32, i32
  }
  func.func @transform_1(%arg0: i32) -> (i32, i32) {
    %c0_i32 = arith.constant 0 : i32
    %c0_i32_0 = arith.constant 0 : i32
    %c0_i32_1 = arith.constant 0 : i32
    return %c0_i32, %c0_i32_0 : i32, i32
  }
  func.func @transform_2(%arg0: i32) -> (i32, i32) {
    %c0_i32 = arith.constant 0 : i32
    %c0_i32_0 = arith.constant 0 : i32
    %c0_i32_1 = arith.constant 0 : i32
    return %c0_i32, %c0_i32_0 : i32, i32
  }
  func.func @transform_3(%arg0: i32) -> (i32, i32) {
    %c0_i32 = arith.constant 0 : i32
    %c0_i32_0 = arith.constant 0 : i32
    return %arg0, %c0_i32 : i32, i32
  }
}

</mosaic_0001>

<bundles_post_ra>
// kernel: tpu_custom_call.1
= control target key start
LH: loop header
LB: loop body
LE: loop exit
PB: predicated region body
PF: predicated region fallthrough
CT: control target
= control target key end

     0   :  { %8 = vsyncpa [#allocation3], 0  ;;  %s908_s0 = inlined_call_operand.hbm [shape: f32[8,8], index: 0, kind: input, shape index: {}]   ;;  %s909_s1 = inlined_call_operand.hbm [shape: bf16[640,128], index: 1, kind: input, shape index: {}]   ;;  %s910_s2 = inlined_call_operand.hbm [shape: f32[56,128], index: 2, kind: input, shape index: {}]   ;;  %s911_s3 = inlined_call_operand.hbm [shape: f32[8,128], index: 3, kind: output, shape index: {}]  }
   0x1   :  { %9 = vsyncpa [#allocation6], 0  ;;  %s26_s14 = sshll.u32 %s909_s1, 4  ;;  %s27_s14 = int_to_ptr.hbm [resolvable:$true] %s26_s14 }
   0x2   :  { %10 = vsyncpa [#allocation4], 0  ;;  %s862_s15 = smov [#allocation5]   ;;  %s16_s19 = sshll.u32 %s908_s0, 4  ;;  %s17_s19 = int_to_ptr.hbm [resolvable:$true] %s16_s19 }
   0x3   :  { %s28_s16 = sshll.u32 %s862_s15, 4  ;;  %s863_s20 = smov 64   ;;  %s29_s16 = int_to_ptr.vmem [resolvable:$true] %s28_s16 }
   0x4   :  { %s864_s21 = smov 4   ;;  %s865_s22 = smov [#allocation2]  }
   0x5   :  { %34 = dma.hbm_to_vmem [thread:$0]  %s27_s14, 5120, %s29_s16, [#allocation6], %s863_s20, %s863_s20, %s864_s21  }
   0x6   :  { %s18_s23 = sshll.u32 %s865_s22, 4  ;;  %s39_s26 = sshll.u32 %s910_s2, 4  ;;  %s19_s23 = int_to_ptr.vmem [resolvable:$true] %s18_s23  ;;  %s40_s26 = int_to_ptr.hbm [resolvable:$true] %s39_s26 }
   0x7   :  { %21 = dma.hbm_to_vmem [thread:$0]  %s17_s19, 128, %s19_s23, [#allocation3]  }
   0x8   :  { %s866_s1 = smov [#allocation7]   ;;  %s867_s28 = smov 128  }
   0x9   :  { %s41_s27 = sshll.u32 %s866_s1, 4  ;;  %s868_s29 = smov 8   ;;  %s42_s27 = int_to_ptr.vmem [resolvable:$true] %s41_s27 }
   0xa   :  { %47 = dma.hbm_to_vmem [thread:$0]  %s40_s26, 896, %s42_s27, [#allocation6], %s867_s28, %s867_s28, %s868_s29  }
   0xb   :  { %856 = dma.done.wait [#allocation3], 128  }
   0xc   :  { %857 = vsyncadd [#allocation3], 4294967168 }
   0xd   :  { %858 = dma.done.wait [#allocation6], 6016  }
   0xe   :  { %859 = vsyncadd [#allocation6], 4294961280  ;;  %vm64_vm0 = vcmask 64512   ;;  %v61_v0 = vld [vmem:[#allocation7] sm:$0xff]  ;;  %v899_v1 = vld [vmem:[#allocation2] sm:$0xff]  ;;  %s869_s0 = smov [#allocation8]  }
   0xf   :  { %v707_v2 = vld [vmem:[#allocation5 + $0x38] sm:$0xff]  ;;  %83 = vmatpush.msra.mxu0 %v61_v0  ;;  %v706_v3 = vld [vmem:[#allocation5 + $0x30] sm:$0xff]  ;;  %v705_v4 = vld [vmem:[#allocation5 + $0x28] sm:$0xff]  ;;  %s526_s2 = sshll.u32 %s869_s0, 4  ;;  %s528_s5 = sshll.u32 %s911_s3, 4  ;;  %s527_s2 = int_to_ptr.vmem [resolvable:$true] %s526_s2  ;;  %s529_s5 = int_to_ptr.hbm [resolvable:$true] %s528_s5 }
  0x10   :  { %539 = vmatmul.msk.f32.vlgmr.msra.gmra.mxu0 %vm64_vm0, %v899_v1  ;;  %156 = vmatpush.bf16.msra.mxu1 %v707_v2  ;;  %v704_v5 = vld [vmem:[#allocation5 + $0x20] sm:$0xff]  ;;  %v703_v6 = vld [vmem:[#allocation5 + $0x18] sm:$0xff]  ;;  %v702_v7 = vld [vmem:[#allocation5 + $0x10] sm:$0xff] }
  0x11   :  { %v701_v8 = vld [vmem:[#allocation5 + $0x8] sm:$0xff]  ;;  %v700_v9 = vld [vmem:[#allocation5] sm:$0xff]  ;;  %v715_v10 = vld [vmem:[#allocation5 + $0x78] sm:$0xff] }
  0x12   :  { %v739_v11 = vld [vmem:[#allocation5 + $0x138] sm:$0xff]  ;;  %237 = vmatpush.bf16.msra.mxu2 %v715_v10  ;;  %v714_v12 = vld [vmem:[#allocation5 + $0x70] sm:$0xff]  ;;  %v713_v14 = vld [vmem:[#allocation5 + $0x68] sm:$0xff] }
  0x13   :  { %v738_v13 = vld [vmem:[#allocation5 + $0x130] sm:$0xff]  ;;  %v737_v15 = vld [vmem:[#allocation5 + $0x128] sm:$0xff]  ;;  %v712_v16 = vld [vmem:[#allocation5 + $0x60] sm:$0xff] }
  0x14   :  { %157 = vmatpush.bf16.msra.mxu1 %v706_v3  ;;  %v736_v17 = vld [vmem:[#allocation5 + $0x120] sm:$0xff]  ;;  %v711_v18 = vld [vmem:[#allocation5 + $0x58] sm:$0xff]  ;;  %v750_v20 = vld [vmem:[#allocation7 + $0x8] ss:$0 sm:$0xff] }
  0x15   :  { %v735_v19 = vld [vmem:[#allocation5 + $0x118] sm:$0xff]  ;;  %v710_v25 = vld [vmem:[#allocation5 + $0x50] sm:$0xff]  ;;  %v709_v27 = vld [vmem:[#allocation5 + $0x48] sm:$0xff] }
  0x16   :  { %238 = vmatpush.bf16.msra.mxu2 %v714_v12  ;;  %v734_v26 = vld [vmem:[#allocation5 + $0x110] sm:$0xff]  ;;  %v733_v28 = vld [vmem:[#allocation5 + $0x108] sm:$0xff]  ;;  %v708_v29 = vld [vmem:[#allocation5 + $0x40] sm:$0xff] }
  0x17   :  { %v732_v30 = vld [vmem:[#allocation5 + $0x100] sm:$0xff]  ;;  %v723_v31 = vld [vmem:[#allocation5 + $0xb8] sm:$0xff]  ;;  %v722_v32 = vld [vmem:[#allocation5 + $0xb0] sm:$0xff] }
  0x18   :  { %158 = vmatpush.bf16.msra.mxu1 %v705_v4  ;;  %318 = vmatpush.bf16.msra.mxu3 %v723_v31  ;;  %v721_v33 = vld [vmem:[#allocation5 + $0xa8] sm:$0xff]  ;;  %v720_v34 = vld [vmem:[#allocation5 + $0xa0] sm:$0xff]  ;;  %v719_v35 = vld [vmem:[#allocation5 + $0x98] sm:$0xff] }
  0x19   :  { %v751_v36 = vld [vmem:[#allocation7 + $0x10] ss:$0 sm:$0xff]  ;;  %v717_v43 = vld [vmem:[#allocation5 + $0x88] sm:$0xff]  ;;  %v716_v44 = vld [vmem:[#allocation5 + $0x80] sm:$0xff] }
  0x1a   :  { %239 = vmatpush.bf16.msra.mxu2 %v713_v14  ;;  %v718_v42 = vld [vmem:[#allocation5 + $0x90] sm:$0xff]  ;;  %v731_v45 = vld [vmem:[#allocation5 + $0xf8] sm:$0xff]  ;;  %v729_v47 = vld [vmem:[#allocation5 + $0xe8] sm:$0xff] }
  0x1b   :  { %399 = vmatpush.bf16.msrb.mxu0 %v731_v45  ;;  %v730_v46 = vld [vmem:[#allocation5 + $0xf0] sm:$0xff]  ;;  %v728_v48 = vld [vmem:[#allocation5 + $0xe0] sm:$0xff]  ;;  %v727_v49 = vld [vmem:[#allocation5 + $0xd8] sm:$0xff] }
  0x1c   :  { %159 = vmatpush.bf16.msra.mxu1 %v704_v5  ;;  %319 = vmatpush.bf16.msra.mxu3 %v722_v32  ;;  %v726_v51 = vld [vmem:[#allocation5 + $0xd0] sm:$0xff]  ;;  %v753_v52 = vld [vmem:[#allocation7 + $0x18] ss:$0 sm:$0xff]  ;;  %v725_v59 = vld [vmem:[#allocation5 + $0xc8] sm:$0xff] }
  0x1d   :  { %v724_v60 = vld [vmem:[#allocation5 + $0xc0] sm:$0xff]  ;;  %v755_v4 = vld [vmem:[#allocation7 + $0x28] ss:$0 sm:$0xff] }
  0x1e   :  { %240 = vmatpush.bf16.msra.mxu2 %v712_v16  ;;  %v754_v61 = vld [vmem:[#allocation7 + $0x20] ss:$0 sm:$0xff] }
  0x1f   :  { %400 = vmatpush.bf16.msrb.mxu0 %v730_v46 }
  0x20   :  { %160 = vmatpush.bf16.msra.mxu1 %v703_v6  ;;  %320 = vmatpush.bf16.msra.mxu3 %v721_v33 }
  0x22   :  { %241 = vmatpush.bf16.msra.mxu2 %v711_v18  ;;  %v424_v18 = vlaneseq }
  0x23   :  { %401 = vmatpush.bf16.msrb.mxu0 %v729_v47 }
  0x24   :  { %161 = vmatpush.bf16.msra.mxu1 %v702_v7  ;;  %321 = vmatpush.bf16.msra.mxu3 %v720_v34 }
  0x26   :  { %242 = vmatpush.bf16.msra.mxu2 %v710_v25 }
  0x27   :  { %402 = vmatpush.bf16.msrb.mxu0 %v728_v48 }
  0x28   :  { %162 = vmatpush.bf16.msra.mxu1 %v701_v8  ;;  %322 = vmatpush.bf16.msra.mxu3 %v719_v35 }
  0x2a   :  { %243 = vmatpush.bf16.msra.mxu2 %v709_v27 }
  0x2b   :  { %403 = vmatpush.bf16.msrb.mxu0 %v727_v49 }
  0x2c   :  { %163 = vmatpush.bf16.msra.mxu1 %v700_v9  ;;  %323 = vmatpush.bf16.msra.mxu3 %v718_v42 }
  0x2e   :  { %244 = vmatpush.bf16.msra.mxu2 %v708_v29 }
  0x2f   :  { %404 = vmatpush.bf16.msrb.mxu0 %v726_v51 }
  0x30   :  { %504 = vmatpush.bf16.msrb.mxu1 %v739_v11  ;;  %324 = vmatpush.bf16.msra.mxu3 %v717_v43 }
  0x33   :  { %405 = vmatpush.bf16.msrb.mxu0 %v725_v59 }
  0x34   :  { %505 = vmatpush.bf16.msrb.mxu1 %v738_v13  ;;  %325 = vmatpush.bf16.msra.mxu3 %v716_v44 }
  0x37   :  { %406 = vmatpush.bf16.msrb.mxu0 %v724_v60 }
  0x38   :  { %506 = vmatpush.bf16.msrb.mxu1 %v737_v15 }
  0x3c   :  { %507 = vmatpush.bf16.msrb.mxu1 %v736_v17 }
  0x40   :  { %508 = vmatpush.bf16.msrb.mxu1 %v735_v19  ;;  %v425_v19 = vshrl.u32 %v424_v18, 7 }
  0x42   :  { %vm428_vm1 = vcmp.eq.s32.totalorder %v425_v19, 0 }
  0x44   :  { %509 = vmatpush.bf16.msrb.mxu1 %v734_v26 }
  0x48   :  { %510 = vmatpush.bf16.msrb.mxu1 %v733_v28 }
  0x4c   :  { %511 = vmatpush.bf16.msrb.mxu1 %v732_v30 }
  0x8d   :  { %v85_v21 = vpop.f32.mrf.mxu0 }
  0x8e   :  { %v86_v22 = vadd.f32 %v750_v20, %v85_v21  ;;  %v427_v20 = vand.u32 127, %v424_v18  ;;  %v752_v21 = vld [vmem:[#allocation7 + $0x30] ss:$0 sm:$0xff] }
  0x90   :  { %756 = vtanh.f32 %v86_v22  ;;  %vm429_vm2 = vcmp.eq.s32.totalorder %v427_v20, 4  ;;  %vm517_vm3 = vcmp.ne.s32.totalorder %v427_v20, 4 }
  0x91   :  { %vm430_vm4 = vmand %vm428_vm1, %vm429_vm2 }
  0x92   :  { %vm518_vm5 = vmand %vm428_vm1, %vm517_vm3 }
  0x96   :  { %v757_v23 = vpop.eup %756 }
  0x97   :  { %v89_v24 = vpack.c.bf16 %v757_v23, %v757_v23 }
  0x99   :  { %164 = vmatmul.bf16.vlgmr.msra.gmra.mxu1 %v89_v24 }
 0x116   :  { %v165_v37 = vpop.f32.mrf.mxu1 }
 0x117   :  { %v166_v38 = vadd.f32 %v751_v36, %v165_v37 }
 0x119   :  { %758 = vtanh.f32 %v166_v38 }
 0x11e   :  { %v167_v39 = vpop.f32.mrf.mxu1 }
 0x11f   :  { %v759_v40 = vpop.eup %758 }
 0x120   :  { %v170_v41 = vpack.c.bf16 %v759_v40, %v759_v40 }
 0x122   :  { %245 = vmatmul.bf16.vlgmr.msra.gmra.mxu2 %v170_v41  ;;  %512 = vmatmul.bf16.vlgmr.msrb.gmra.mxu1 %v170_v41 }
 0x19f   :  { %v513_v50 = vpop.f32.mrf.mxu1 }
 0x1a5   :  { %v246_v53 = vpop.f32.mrf.mxu2 }
 0x1a6   :  { %v247_v54 = vadd.f32 %v753_v52, %v246_v53 }
 0x1a7   :  { %v515_v55 = vpop.f32.mrf.mxu1 }
 0x1a8   :  { %v250_v56 = vmax.f32 %v247_v54, 0.0 }
 0x1aa   :  { %v251_v57 = vpack.c.bf16 %v250_v56, %v250_v56 }
 0x1ac   :  { %326 = vmatmul.bf16.vlgmr.msra.gmra.mxu3 %v251_v57 }
 0x1ad   :  { %v248_v58 = vpop.f32.mrf.mxu2 }
 0x22f   :  { %v327_v62 = vpop.f32.mrf.mxu3 }
 0x230   :  { %v328_v63 = vadd.f32 %v754_v61, %v327_v62 }
 0x232   :  { %v331_v0 = vmax.f32 %v328_v63, 0.0 }
 0x234   :  { %v332_v2 = vpack.c.bf16 %v331_v0, %v331_v0 }
 0x236   :  { %407 = vmatmul.bf16.vlgmr.msrb.gmra.mxu0 %v332_v2 }
 0x237   :  { %v329_v3 = vpop.f32.mrf.mxu3 }
 0x2b3   :  { %v408_v5 = vpop.f32.mrf.mxu0 }
 0x2b4   :  { %v409_v6 = vadd.f32 %v755_v4, %v408_v5 }
 0x2b6   :  { %v412_v7 = vsub.f32 %v409_v6, %v899_v1  ;;  %v514_v1 = vadd.f32 %v752_v21, %v513_v50 }
 0x2b8   :  { %v413_v8 = vmul.f32 %v412_v7, %v412_v7 }
 0x2ba   :  { %v414_v9 = vsel %vm64_vm0, %v413_v8, 0.0 }
 0x2bb   :  { %v410_v10 = vpop.f32.mrf.mxu0  ;;  %415 = vadd.xlane.f32.xlu0 %v414_v9 }
 0x32e   :  { %v416_v11 = vpop.xlane.xlu0 %415 }
 0x32f   :  { %v417_v12 = vrot.slane %v416_v11, 4 }
 0x331   :  { %v418_v13 = vadd.f32 %v417_v12, %v416_v11 }
 0x333   :  { %v419_v14 = vrot.slane %v418_v13, 2 }
 0x335   :  { %v420_v15 = vadd.f32 %v419_v14, %v418_v13 }
 0x337   :  { %v421_v16 = vrot.slane %v420_v15, 1 }
 0x339   :  { %v422_v17 = vadd.f32 %v421_v16, %v420_v15 }
 0x33b   :  { %740 = vpush %v422_v17 }
 0x36c   :  { %s741_s6 = spop %740 }
 0x36d   :  { %v431_v22 = vstv %s741_s6 }
 0x36e   :  { %v432_v23 = vsel %vm430_vm4, %v431_v22, 0.0 }
 0x36f   :  { %v519_v24 = vsel %vm518_vm5, %v514_v1, %v432_v23 }
 0x370   :  { %520 = vst [vmem:[#allocation8] sm:$0xff] %v519_v24 }
 0x371   :  { %531 = dma.vmem_to_hbm [thread:$0]  %s527_s2, 128, %s529_s5, [#allocation4]  }
 0x372   :  { %860 = dma.done.wait [#allocation4], 128  }
 0x373   :  { %861 = vsyncadd [#allocation4], 4294967168 }
 0x374   :  { %536 = vsyncpa [#allocation3], 1 }
 0x375   :  { %537 = vsyncpa [#allocation6], 1 }
 0x376   :  { %538 = vsyncpa [#allocation4], 1 }

</bundles_post_ra>
